<compile_context>
chip_gen: v7x
topology: tpu7x:2x2x1
jax: 0.10.0
libtpu: 0.0.40
codegen_flags: <defaults>
</compile_context>

<pallas_src>
import functools

import jax
import jax.numpy as jnp
from jax.experimental import pallas as pl
from jax.experimental.pallas import tpu as pltpu

_MIB = 1024 * 1024


def _round_up(x, m):
    return (x + m - 1) // m * m


def _compiler_params(semantics, vmem_bytes_needed):
    """VMEM limit from the actual (double-buffered) tile footprint.

    Never below the 32 MiB scoped default, never above 48 MiB so the config
    stays safe on v7x (64 MiB physical per core).
    """
    limit = int(min(48 * _MIB, max(32 * _MIB, 2 * int(vmem_bytes_needed))))
    return pltpu.CompilerParams(dimension_semantics=semantics,
                                vmem_limit_bytes=limit)


# -----------------------------------------------------------------------------
# Pallas kernels
# -----------------------------------------------------------------------------
def _matmul_kernel(x_ref, w_ref, b_ref, *rest, relu, has_residual):
    """Single-pass matmul (K collapsed, weight resident) + fused epilogue."""
    if has_residual:
        res_ref, o_ref = rest
    else:
        (o_ref,) = rest
    y = jnp.dot(x_ref[...], w_ref[...], preferred_element_type=jnp.float32)
    y = y + b_ref[...]
    if has_residual:
        y = y + res_ref[...].astype(jnp.float32)
    if relu:
        y = jnp.maximum(y, 0.0)
    o_ref[...] = y.astype(o_ref.dtype)


def _conv3x3_kernel(x_ref, w_ref, b_ref, o_ref, acc_ref, *, wo, cp, relu):
    """Fused stride-1 3x3 conv: one padded input row per grid step.

    grid = (N, Ho, n_tiles, 3); the last axis is the vertical tap (reduction).
    x_ref: (Wp, Cp) one input row; w_ref: (3*Cp, tn) weights for this vertical
    tap (dj-major); acc f32 scratch is bias-initialised at tap 0.
    """
    di = pl.program_id(3)

    @pl.when(di == 0)
    def _():
        acc_ref[...] = jnp.broadcast_to(b_ref[...], acc_ref.shape)

    for dj in range(3):                       # horizontal taps: static slices
        xs = x_ref[dj:dj + wo, :]
        acc_ref[...] += jnp.dot(xs, w_ref[dj * cp:(dj + 1) * cp, :],
                                preferred_element_type=jnp.float32)

    @pl.when(di == pl.num_programs(3) - 1)
    def _():
        y = acc_ref[...]
        if relu:
            y = jnp.maximum(y, 0.0)
        o_ref[...] = y.astype(o_ref.dtype)


def _maxpool_kernel(xe0_ref, xe1_ref, xe2_ref, xo0_ref, xo1_ref, xo2_ref,
                    o_ref, *, wm):
    """3x3/s2 max-pool for one output row from even/odd column planes."""
    r = jnp.maximum(xe0_ref[0:wm, :], xe0_ref[1:wm + 1, :])
    r = jnp.maximum(r, xo0_ref[0:wm, :])
    for xe_ref in (xe1_ref, xe2_ref):
        r = jnp.maximum(r, jnp.maximum(xe_ref[0:wm, :], xe_ref[1:wm + 1, :]))
    for xo_ref in (xo1_ref, xo2_ref):
        r = jnp.maximum(r, xo_ref[0:wm, :])
    o_ref[...] = r


def _gap_kernel(x_ref, o_ref):
    # x_ref: (N, H*W, tc) -> mean over spatial axis (AdaptiveAvgPool2d((1,1))).
    o_ref[...] = jnp.mean(x_ref[...].astype(jnp.float32), axis=1)


# -----------------------------------------------------------------------------
# Pallas wrappers
# -----------------------------------------------------------------------------
def matmul_bias_act(x, wmat, bias, relu, residual=None):
    """y = [relu](x @ wmat + bias [+ residual]); returns (M, Np) bf16.

    x: (M, Kp) activation (channels already carried at Kp), wmat: (Kp, Np)
    pre-padded bf16, bias: (1, Np) f32.  Channel padding is kept in the output.
    """
    M, K = x.shape
    Kp, Np = wmat.shape
    assert K == Kp, (K, Kp)
    x = x.astype(jnp.bfloat16)

    tm = min(512, _round_up(M, 8))
    Mp = _round_up(M, tm)
    if Mp != M:
        x = jnp.pad(x, ((0, Mp - M), (0, 0)))
    tn = min(512, Np)
    # Keep >=2 parallel tiles where possible (v7x megacore).
    if Mp // tm == 1 and Np // tn < 2 and Np >= 256 and (Np // 2) % 128 == 0:
        tn = Np // 2

    inputs = [x, wmat, bias]
    in_specs = [
        pl.BlockSpec((tm, Kp), lambda m, n: (m, 0)),
        pl.BlockSpec((Kp, tn), lambda m, n: (0, n)),
        pl.BlockSpec((1, tn), lambda m, n: (0, n)),
    ]
    if residual is not None:
        res = residual.astype(jnp.bfloat16)
        if res.shape[0] != Mp:
            res = jnp.pad(res, ((0, Mp - res.shape[0]), (0, 0)))
        inputs.append(res)
        in_specs.append(pl.BlockSpec((tm, tn), lambda m, n: (m, n)))

    vmem = 2 * (tm * Kp * 2 + Kp * tn * 2 + tn * 4 + tm * tn * 2)
    if residual is not None:
        vmem += 2 * tm * tn * 2

    out = pl.pallas_call(
        functools.partial(_matmul_kernel, relu=relu,
                          has_residual=residual is not None),
        out_shape=jax.ShapeDtypeStruct((Mp, Np), jnp.bfloat16),
        grid_spec=pltpu.PrefetchScalarGridSpec(
            num_scalar_prefetch=0,
            grid=(Mp // tm, Np // tn),
            in_specs=in_specs,
            out_specs=pl.BlockSpec((tm, tn), lambda m, n: (m, n)),
        ),
        compiler_params=_compiler_params(("parallel", "parallel"), vmem),
    )(*inputs)
    if Mp != M:
        out = out[:M]
    return out


def conv3x3_s1_fused(x, p, relu):
    """Fused stride-1 3x3 conv + folded BN (+ReLU) on NHWC, no HBM im2col."""
    N, H, W, Cp = x.shape
    assert Cp == p["cp"], (Cp, p["cp"])
    Np = p["np"]
    xp = jnp.pad(x.astype(jnp.bfloat16), ((0, 0), (1, 1), (1, 1), (0, 0)))
    Wp = W + 2
    Ho, Wo = H, W
    tn = min(512, Np)
    vmem = (2 * (Wp * Cp * 2 + 3 * Cp * tn * 2 + tn * 4 + Wo * tn * 2)
            + Wo * tn * 4)
    out = pl.pallas_call(
        functools.partial(_conv3x3_kernel, wo=Wo, cp=Cp, relu=relu),
        out_shape=jax.ShapeDtypeStruct((N, Ho, Wo, Np), jnp.bfloat16),
        grid_spec=pltpu.PrefetchScalarGridSpec(
            num_scalar_prefetch=0,
            grid=(N, Ho, Np // tn, 3),
            in_specs=[
                pl.BlockSpec((None, None, Wp, Cp),
                             lambda b, h, n, di: (b, h + di, 0, 0)),
                pl.BlockSpec((None, 3 * Cp, tn),
                             lambda b, h, n, di: (di, 0, n)),
                pl.BlockSpec((1, tn), lambda b, h, n, di: (0, n)),
            ],
            out_specs=pl.BlockSpec((None, None, Wo, tn),
                                   lambda b, h, n, di: (b, h, 0, n)),
            scratch_shapes=[pltpu.VMEM((Wo, tn), jnp.float32)],
        ),
        compiler_params=_compiler_params(
            ("parallel", "parallel", "parallel", "arbitrary"), vmem),
    )(xp, p["wmat"], p["bias"])
    return out


def maxpool_3x3_s2(x):
    """nn.MaxPool2d(kernel_size=3, stride=2, padding=1) on NHWC (fused taps)."""
    N, H, W, C = x.shape
    neg = jnp.finfo(x.dtype).min
    xp = jnp.pad(x, ((0, 0), (1, 1), (1, 1), (0, 0)), constant_values=neg)
    Hm = (H - 1) // 2 + 1
    Wm = (W - 1) // 2 + 1
    # Even/odd column planes: all 9 taps become contiguous shifted reads.
    xe = xp[:, :, 0::2, :]
    xo = xp[:, :, 1::2, :]
    We, Wod = xe.shape[2], xo.shape[2]

    in_specs = []
    for di in range(3):
        in_specs.append(pl.BlockSpec(
            (None, None, We, C), lambda b, h, di=di: (b, 2 * h + di, 0, 0)))
    for di in range(3):
        in_specs.append(pl.BlockSpec(
            (None, None, Wod, C), lambda b, h, di=di: (b, 2 * h + di, 0, 0)))

    vmem = 2 * (3 * We * C * 2 + 3 * Wod * C * 2 + Wm * C * 2)
    return pl.pallas_call(
        functools.partial(_maxpool_kernel, wm=Wm),
        out_shape=jax.ShapeDtypeStruct((N, Hm, Wm, C), x.dtype),
        grid_spec=pltpu.PrefetchScalarGridSpec(
            num_scalar_prefetch=0,
            grid=(N, Hm),
            in_specs=in_specs,
            out_specs=pl.BlockSpec((None, None, Wm, C),
                                   lambda b, h: (b, h, 0, 0)),
        ),
        compiler_params=_compiler_params(("parallel", "parallel"), vmem),
    )(xe, xe, xe, xo, xo, xo)


def global_avg_pool(x):
    """AdaptiveAvgPool2d((1,1)) + squeeze -> (N, C) float32."""
    N, H, W, C = x.shape
    xr = x.reshape(N, H * W, C)
    tc = 256 if C % 256 == 0 else 128
    vmem = 2 * (N * H * W * tc * 2 + N * tc * 4)
    return pl.pallas_call(
        _gap_kernel,
        out_shape=jax.ShapeDtypeStruct((N, C), jnp.float32),
        grid_spec=pltpu.PrefetchScalarGridSpec(
            num_scalar_prefetch=0,
            grid=(C // tc,),
            in_specs=[pl.BlockSpec((N, H * W, tc), lambda c: (0, 0, c))],
            out_specs=pl.BlockSpec((N, tc), lambda c: (0, c)),
        ),
        compiler_params=_compiler_params(("parallel",), vmem),
    )(xr)


# -----------------------------------------------------------------------------
# ResNet building blocks (glue in plain JAX, hot path in Pallas)
# -----------------------------------------------------------------------------
def _im2col(x, kh, kw, stride, pad):
    """x: (N,H,W,C) -> cols (N*Ho*Wo, kh*kw*C) ordered (i, j, c)."""
    N, H, W, C = x.shape
    xp = jnp.pad(x, ((0, 0), (pad, pad), (pad, pad), (0, 0)))
    Hp, Wp = H + 2 * pad, W + 2 * pad
    Ho = (Hp - kh) // stride + 1
    Wo = (Wp - kw) // stride + 1
    cols = []
    for i in range(kh):
        for j in range(kw):
            cols.append(xp[:, i:i + stride * (Ho - 1) + 1:stride,
                           j:j + stride * (Wo - 1) + 1:stride, :])
    patches = jnp.stack(cols, axis=3)                      # (N,Ho,Wo,kh*kw,C)
    return patches.reshape(N * Ho * Wo, kh * kw * C), (N, Ho, Wo)


def conv_bn(x, p, stride, relu, residual=None):
    """Conv2d(bias=False, padding=k//2) + folded eval-BN (+residual)(+ReLU)."""
    k = p["k"]
    if p.get("fused3", False):
        assert stride == 1
        return conv3x3_s1_fused(x, p, relu)
    if k == 1:
        if stride > 1:
            x = x[:, ::stride, ::stride, :]
        N, Ho, Wo, Cp = x.shape
        cols = x.reshape(N * Ho * Wo, Cp)
    else:
        # 7x7 embedder / stride-2 3x3: im2col fallback (small tensors here).
        cols, (N, Ho, Wo) = _im2col(x.astype(jnp.bfloat16), k, k, stride, k // 2)
        Kp = p["wmat"].shape[0]
        if cols.shape[1] != Kp:
            cols = jnp.pad(cols, ((0, 0), (0, Kp - cols.shape[1])))
    res_flat = None
    if residual is not None:
        res_flat = residual.reshape(N * Ho * Wo, residual.shape[-1])
    y = matmul_bias_act(cols, p["wmat"], p["bias"], relu, residual=res_flat)
    return y.reshape(N, Ho, Wo, p["np"])


def bottleneck_forward(x, layer):
    stride = layer["stride"]
    if "shortcut" in layer:
        residual = conv_bn(x, layer["shortcut"], stride=stride, relu=False)
    else:
        residual = x
    y = conv_bn(x, layer["conv1"], stride=1, relu=True)                # 1x1 reduce
    y = conv_bn(y, layer["conv2"], stride=stride, relu=True)           # 3x3
    # 1x1 expand with residual add + ReLU fused into the matmul epilogue.
    y = conv_bn(y, layer["conv3"], stride=1, relu=True, residual=residual)
    return y


def _to_nchw(h, true_c):
    return jnp.transpose(h[..., :true_c], (0, 3, 1, 2)).astype(jnp.float32)


def resnet_forward(params, x_nchw, output_hidden_states=False):
    """Mirrors ResNetModel forward + pooler_output.squeeze(-1).squeeze(-1)."""
    x = jnp.transpose(x_nchw, (0, 2, 3, 1)).astype(jnp.bfloat16)  # NCHW -> NHWC
    # embedder: 7x7/s2 conv + BN + ReLU, then 3x3/s2 maxpool
    h = conv_bn(x, params["embedder"], stride=2, relu=True)
    h = maxpool_3x3_s2(h)
    true_c = params["embedder"]["cout"]

    hidden_states = []
    for stage in params["stages"]:
        if output_hidden_states:
            hidden_states.append(_to_nchw(h, true_c))
        for layer in stage:
            h = bottleneck_forward(h, layer)
        true_c = stage[-1]["conv3"]["cout"]
    if output_hidden_states:
        hidden_states.append(_to_nchw(h, true_c))

    pooled = global_avg_pool(h)                  # (N, Cp) float32
    if pooled.shape[1] != true_c:
        pooled = pooled[:, :true_c]
    return pooled, (hidden_states if output_hidden_states else None)


# -----------------------------------------------------------------------------
# Deterministic synthetic parameter initialization
# (shapes follow default HF ResNetConfig: embedding_size=64,
#  hidden_sizes=[256,512,1024,2048], depths=[3,4,6,3], bottleneck layers)
# Eval-mode BN is folded into the weights; weights are stored pre-transposed,
# padded to 128-aligned channel counts and cast to bf16 once.
# -----------------------------------------------------------------------------
def _init_conv_bn(key, cin, cout, k, *, cin_carried=None, fused3=False):
    cin_carried = _round_up(cin, 128) if cin_carried is None else cin_carried
    k0, k1, k2, k3, k4 = jax.random.split(key, 5)
    w = jax.random.normal(k0, (cout, cin, k, k), jnp.float32) * jnp.sqrt(
        2.0 / (cin * k * k))
    gamma = 1.0 + 0.1 * jax.random.normal(k1, (cout,), jnp.float32)
    beta = 0.1 * jax.random.normal(k2, (cout,), jnp.float32)
    rmean = 0.1 * jax.random.normal(k3, (cout,), jnp.float32)
    rvar = 0.5 + jnp.abs(jax.random.normal(k4, (cout,), jnp.float32)) * 0.5
    eps = 1e-5
    scale = gamma / jnp.sqrt(rvar + eps)
    bias = beta - rmean * scale
    Np = _round_up(cout, 128)
    # pad cin up to the carried channel count (zeros -> no contribution)
    wp = jnp.pad(w, ((0, 0), (0, cin_carried - cin), (0, 0), (0, 0)))
    if fused3:
        # (Cout,Cc,3,3) -> (di,dj,Cc,Cout) -> (3, 3*Cc, Cout); fold BN scale.
        wmat = (jnp.transpose(wp, (2, 3, 1, 0)).reshape(3, 3 * cin_carried, cout)
                * scale[None, None, :])
        wmat = jnp.pad(wmat, ((0, 0), (0, 0), (0, Np - cout))).astype(jnp.bfloat16)
    else:
        K = k * k * cin_carried
        wmat = (jnp.transpose(wp, (2, 3, 1, 0)).reshape(K, cout)
                * scale[None, :])
        Kp = _round_up(K, 128)
        wmat = jnp.pad(wmat, ((0, Kp - K), (0, Np - cout))).astype(jnp.bfloat16)
    bias_p = jnp.pad(bias.reshape(1, cout), ((0, 0), (0, Np - cout)))
    return {"wmat": wmat, "bias": bias_p.astype(jnp.float32),
            "k": k, "cin": cin, "cout": cout, "cp": cin_carried, "np": Np,
            "fused3": fused3}


def init_resnet_params(key, num_channels, embedding_size=64,
                       hidden_sizes=(256, 512, 1024, 2048),
                       depths=(3, 4, 6, 3)):
    counter = [0]

    def nk():
        counter[0] += 1
        return jax.random.fold_in(key, counter[0])

    params = {"embedder": _init_conv_bn(nk(), num_channels, embedding_size, 7,
                                        cin_carried=num_channels)}
    stages = []
    in_c = embedding_size
    for si, (out_c, depth) in enumerate(zip(hidden_sizes, depths)):
        stage_stride = 1 if si == 0 else 2  # downsample_in_first_stage=False
        layers = []
        for li in range(depth):
            s = stage_stride if li == 0 else 1
            ic = in_c if li == 0 else out_c
            reduced = out_c // 4
            layer = {
                "conv1": _init_conv_bn(nk(), ic, reduced, 1),
                "conv2": _init_conv_bn(nk(), reduced, reduced, 3, fused3=(s == 1)),
                "conv3": _init_conv_bn(nk(), reduced, out_c, 1),
                "stride": s,
            }
            if ic != out_c or s != 1:
                layer["shortcut"] = _init_conv_bn(nk(), ic, out_c, 1)
            layers.append(layer)
        stages.append(layers)
        in_c = out_c
    params["stages"] = stages
    return params


# -----------------------------------------------------------------------------
if __name__ == "__main__":
    key = jax.random.PRNGKey(0)
    nb_channels = 4
    nb_labels = 3  # unused by ResNetModel forward (no classification head)

    params = init_resnet_params(jax.random.fold_in(key, 1), nb_channels)
    x = jax.random.normal(jax.random.fold_in(key, 2),
                          (2, nb_channels, 16, 16), jnp.float32)

    pooled, hidden_states = resnet_forward(params, x,
                                           output_hidden_states=False)
    pooled = jax.block_until_ready(pooled)

    assert pooled.shape == (2, 2048), pooled.shape
    assert hidden_states is None
    assert bool(jnp.all(jnp.isfinite(pooled)))
    print("KERNEL_OK")
</pallas_src>

<mosaic_0001>
module attributes {stable_mosaic.version = 11 : i64} {
  func.func @_matmul_kernel(%arg0: i32, %arg1: i32, %arg2: memref<128x256xbf16, #tpu.memory_space<vmem>>, %arg3: memref<256x128xbf16, #tpu.memory_space<vmem>>, %arg4: memref<1x128xf32, #tpu.memory_space<vmem>>, %arg5: memref<128x128xbf16, #tpu.memory_space<vmem>>) attributes {dimension_semantics = [#tpu.dimension_semantics<parallel>, #tpu.dimension_semantics<parallel>], iteration_bounds = array<i64: 1, 1>, scalar_prefetch = 0 : i64, scratch_operands = 0 : i64, tpu.core_type = #tpu.core_type<tc>, window_params = [{transform_indices = @transform_0, window_bounds = array<i64: 128, 256>}, {transform_indices = @transform_1, window_bounds = array<i64: 256, 128>}, {transform_indices = @transform_2, window_bounds = array<i64: 1, 128>}, {transform_indices = @transform_3, window_bounds = array<i64: 128, 128>}]} {
    %c0 = arith.constant 0 : index
    %c0_0 = arith.constant 0 : index
    %0 = vector.load %arg2[%c0, %c0_0] : memref<128x256xbf16, #tpu.memory_space<vmem>>, vector<128x256xbf16>
    %c0_1 = arith.constant 0 : index
    %c0_2 = arith.constant 0 : index
    %1 = vector.load %arg3[%c0_1, %c0_2] : memref<256x128xbf16, #tpu.memory_space<vmem>>, vector<256x128xbf16>
    %cst = arith.constant dense<0.000000e+00> : vector<128x128xf32>
    %2 = tpu.matmul %0, %1, %cst {dimension_numbers = #tpu.dot_dimension_numbers<[1], [0], [0], [1], [0, 0, 1, 1], [], []>} : vector<128x256xbf16>, vector<256x128xbf16>, vector<128x128xf32> -> vector<128x128xf32>
    %c0_3 = arith.constant 0 : index
    %c0_4 = arith.constant 0 : index
    %3 = vector.load %arg4[%c0_3, %c0_4] : memref<1x128xf32, #tpu.memory_space<vmem>>, vector<1x128xf32>
    %4 = vector.broadcast %3 : vector<1x128xf32> to vector<128x128xf32>
    %5 = arith.addf %2, %4 : vector<128x128xf32>
    %cst_5 = arith.constant 0.000000e+00 : f32
    %6 = vector.broadcast %cst_5 : f32 to vector<128x128xf32>
    %7 = arith.maximumf %5, %6 : vector<128x128xf32>
    %8 = arith.truncf %7 : vector<128x128xf32> to vector<128x128xbf16>
    %c0_6 = arith.constant 0 : index
    %c0_7 = arith.constant 0 : index
    %9 = vector.load %arg5[%c0_6, %c0_7] : memref<128x128xbf16, #tpu.memory_space<vmem>>, vector<128x128xbf16>
    tpu.vector_store %arg5[%c0_6, %c0_7], %8 {strides = array<i32>} : memref<128x128xbf16, #tpu.memory_space<vmem>>, vector<128x128xbf16>,
    return
  }
  func.func @transform_0(%arg0: i32, %arg1: i32) -> (i32, i32) {
    %c0_i32 = arith.constant 0 : i32
    %c0_i32_0 = arith.constant 0 : i32
    return %arg0, %c0_i32 : i32, i32
  }
  func.func @transform_1(%arg0: i32, %arg1: i32) -> (i32, i32) {
    %c0_i32 = arith.constant 0 : i32
    %c0_i32_0 = arith.constant 0 : i32
    return %c0_i32, %arg1 : i32, i32
  }
  func.func @transform_2(%arg0: i32, %arg1: i32) -> (i32, i32) {
    %c0_i32 = arith.constant 0 : i32
    %c0_i32_0 = arith.constant 0 : i32
    return %c0_i32, %arg1 : i32, i32
  }
  func.func @transform_3(%arg0: i32, %arg1: i32) -> (i32, i32) {
    %c0_i32 = arith.constant 0 : i32
    return %arg0, %arg1 : i32, i32
  }
}

</mosaic_0001>

<bundles_post_ra>
// kernel: tpu_custom_call.1
= control target key start
LH: loop header
LB: loop body
LE: loop exit
PB: predicated region body
PF: predicated region fallthrough
CT: control target
= control target key end

     0   :  { %8 = vsyncpa [#allocation3], 0  ;;  %s887_s0 = inlined_call_operand.hbm [shape: bf16[128,256], index: 0, kind: input, shape index: {}]   ;;  %s888_s1 = inlined_call_operand.hbm [shape: bf16[256,128], index: 1, kind: input, shape index: {}]   ;;  %s889_s2 = inlined_call_operand.vmem [shape: f32[1,128], index: 2, kind: input, shape index: {}]   ;;  %s890_s3 = inlined_call_operand.hbm [shape: bf16[128,128], index: 3, kind: output, shape index: {}]  }
   0x1   :  { %9 = vsyncpa [#allocation6], 0 }
   0x2   :  { %10 = vsyncpa [#allocation4], 0  ;;  %s797_s12 = smov [#allocation2]   ;;  %s725_s16 = scalar_lea.hbm %s887_s0, 2048 }
   0x3   :  { %s16_s13 = sshll.u32 %s797_s12, 4  ;;  %p726_p0 = scmp.ne.s32.totalorder %s887_s0, %s725_s16  ;;  %s17_s13 = int_to_ptr.vmem [resolvable:$true] %s16_s13 }
   0x4   :  { %p729_p1 = scmp.lt.u32.totalorder %s725_s16, %s887_s0 }
   0x6   :  { %p731_p2 = pnand %p729_p1, %p726_p0 }
   0x8   :  { %734 = shalt.err (!%p731_p2)
}
   0x9   :  { %s735_s21 = scalar_lea.vmem %s17_s13, 2048  ;;  %p740_p4 = scmp.lt.s32.totalorder %s17_s13, %s17_s13 }
   0xa   :  { %p736_p3 = scmp.ne.s32.totalorder %s17_s13, %s735_s21  ;;  %p741_p5 = scmp.lt.s32.totalorder %s735_s21, %s735_s21 }
   0xc   :  { %p742_p6 = por %p741_p5, %p740_p4 }
   0xe   :  { %p743_p7 = pnand %p742_p6, %p736_p3 }
  0x10   :  { %746 = shalt.err (!%p743_p7)
}
  0x11   :  { %s798_s22 = smov 128   ;;  %s799_s23 = smov 8  }
  0x12   :  { %22 = dma.hbm_to_vmem [thread:$0]  %s887_s0, 2048, %s17_s13, [#allocation3], %s798_s22, %s798_s22, %s799_s23  }
  0x13   :  { %s800_s26 = smov [#allocation5]   ;;  %s747_s30 = scalar_lea.hbm %s888_s1, 2048 }
  0x14   :  { %s28_s27 = sshll.u32 %s800_s26, 4  ;;  %p748_p8 = scmp.ne.s32.totalorder %s888_s1, %s747_s30  ;;  %s29_s27 = int_to_ptr.vmem [resolvable:$true] %s28_s27 }
  0x15   :  { %p751_p9 = scmp.lt.u32.totalorder %s747_s30, %s888_s1 }
  0x17   :  { %p753_p10 = pnand %p751_p9, %p748_p8 }
  0x19   :  { %756 = shalt.err (!%p753_p10)
}
  0x1a   :  { %s757_s8 = scalar_lea.vmem %s29_s27, 2048  ;;  %p762_p12 = scmp.lt.s32.totalorder %s29_s27, %s29_s27 }
  0x1b   :  { %p758_p11 = scmp.ne.s32.totalorder %s29_s27, %s757_s8  ;;  %p763_p13 = scmp.lt.s32.totalorder %s757_s8, %s757_s8 }
  0x1d   :  { %p764_p0 = por %p763_p13, %p762_p12 }
  0x1f   :  { %p765_p1 = pnand %p764_p0, %p758_p11 }
  0x21   :  { %768 = shalt.err (!%p765_p1)
}
  0x22   :  { %s801_s0 = smov 64   ;;  %s802_s9 = smov 4  }
  0x23   :  { %34 = dma.hbm_to_vmem [thread:$0]  %s888_s1, 2048, %s29_s27, [#allocation6], %s801_s0, %s801_s0, %s802_s9  }
  0x24   :  { %791 = dma.done.wait [#allocation3], 2048  }
  0x25   :  { %792 = vsyncadd [#allocation3], 4294965248 }
  0x26   :  { %793 = dma.done.wait [#allocation6], 2048  }
  0x27   :  { %794 = vsyncadd [#allocation6], 4294965248  ;;  %v685_v0 = vld [vmem:[#allocation5 + $0x40] sm:$0xff]   ;;  %v687_v2 = vld [vmem:[#allocation5 + $0x48] sm:$0xff]  }
  0x28   :  { %v686_v1 = vld [vmem:[#allocation5] sm:$0xff]   ;;  %598 = vmatprep.subr.bf16.mxu0 %v685_v0  ;;  %662 = vmatprep.subr.bf16.mxu1 %v685_v0  ;;  %v688_v3 = vld [vmem:[#allocation5 + $0x8] sm:$0xff]   ;;  %v689_v4 = vld [vmem:[#allocation5 + $0x50] sm:$0xff]  }
  0x29   :  { %599 = vmatpush3.bf16.msra.mxu0 %v686_v1  ;;  %670 = vmatpush3.bf16.msra.mxu1 %v686_v1  ;;  %v690_v5 = vld [vmem:[#allocation5 + $0x10] sm:$0xff]   ;;  %v691_v6 = vld [vmem:[#allocation5 + $0x58] sm:$0xff]   ;;  %v693_v8 = vld [vmem:[#allocation5 + $0x60] sm:$0xff]  }
  0x2a   :  { %600 = vmatprep.subr.bf16.mxu0 %v687_v2  ;;  %663 = vmatprep.subr.bf16.mxu1 %v687_v2  ;;  %v692_v7 = vld [vmem:[#allocation5 + $0x18] sm:$0xff]   ;;  %v694_v9 = vld [vmem:[#allocation5 + $0x20] sm:$0xff]   ;;  %v695_v10 = vld [vmem:[#allocation5 + $0x68] sm:$0xff]  }
  0x2b   :  { %v703_v11 = vld [vmem:[#allocation2 + $0x4] ss:$8 sps:$4 sm:$0xff]   ;;  %v697_v14 = vld [vmem:[#allocation5 + $0x70] sm:$0xff]   ;;  %v699_v16 = vld [vmem:[#allocation5 + $0x78] sm:$0xff]  }
  0x2c   :  { %v706_v12 = vld [vmem:[#allocation2 + $0x44] ss:$8 sps:$4 sm:$0xff]   ;;  %307 = vmatprep.mubr.bf16.mxu0 %v703_v11  ;;  %v698_v15 = vld [vmem:[#allocation5 + $0x30] sm:$0xff]   ;;  %v700_v17 = vld [vmem:[#allocation5 + $0x38] sm:$0xff]  }
  0x2d   :  { %601 = vmatpush3.bf16.msra.mxu0 %v688_v3  ;;  %671 = vmatpush3.bf16.msra.mxu1 %v688_v3  ;;  %v696_v13 = vld [vmem:[#allocation5 + $0x28] sm:$0xff]   ;;  %v707_v20 = vld [vmem:[#allocation2 + $0x14] ss:$8 sps:$4 sm:$0xff]   ;;  %v711_v22 = vld [vmem:[#allocation2 + $0x10] ss:$8 sps:$4 sm:$0xff]  }
  0x2e   :  { %602 = vmatprep.subr.bf16.mxu0 %v689_v4  ;;  %664 = vmatprep.subr.bf16.mxu1 %v689_v4  ;;  %v701_v18 = vld [vmem:[#allocation2] ss:$8 sps:$4 sm:$0xff]   ;;  %v709_v21 = vld [vmem:[#allocation2 + $0x54] ss:$8 sps:$4 sm:$0xff]   ;;  %v712_v23 = vld [vmem:[#allocation2 + $0x50] ss:$8 sps:$4 sm:$0xff]  }
  0x2f   :  { %339 = vmatprep.mubr.bf16.mxu1 %v706_v12  ;;  %v704_v19 = vld [vmem:[#allocation2 + $0x40] ss:$8 sps:$4 sm:$0xff]   ;;  %v713_v24 = vld [vmem:[#allocation2 + $0x24] ss:$8 sps:$4 sm:$0xff]   ;;  %v719_v28 = vld [vmem:[#allocation2 + $0x34] ss:$8 sps:$4 sm:$0xff]  }
  0x30   :  { %v715_v25 = vld [vmem:[#allocation2 + $0x64] ss:$8 sps:$4 sm:$0xff]   ;;  %v717_v26 = vld [vmem:[#allocation2 + $0x20] ss:$8 sps:$4 sm:$0xff]   ;;  %v721_v29 = vld [vmem:[#allocation2 + $0x74] ss:$8 sps:$4 sm:$0xff]  }
  0x31   :  { %603 = vmatpush3.bf16.msra.mxu0 %v690_v5  ;;  %672 = vmatpush3.bf16.msra.mxu1 %v690_v5  ;;  %v718_v27 = vld [vmem:[#allocation2 + $0x60] ss:$8 sps:$4 sm:$0xff]   ;;  %v723_v30 = vld [vmem:[#allocation2 + $0x30] ss:$8 sps:$4 sm:$0xff]  }
  0x32   :  { %604 = vmatprep.subr.bf16.mxu0 %v691_v6  ;;  %665 = vmatprep.subr.bf16.mxu1 %v691_v6  ;;  %v724_v31 = vld [vmem:[#allocation2 + $0x70] ss:$8 sps:$4 sm:$0xff]   ;;  %v854_v34 = vld [vmem:[%s889_s2] ss:$0 sm:$0xff]  ;;  %s803_s2 = smov [#allocation7]  }
  0x33   :  { %s473_s13 = sshll.u32 %s803_s2, 4  ;;  %s474_s13 = int_to_ptr.vmem [resolvable:$true] %s473_s13 }
  0x34   :  { %s769_s14 = scalar_lea.vmem %s474_s13, 1024  ;;  %p774_p3 = scmp.lt.s32.totalorder %s474_s13, %s474_s13 }
  0x35   :  { %605 = vmatpush3.bf16.msra.mxu0 %v692_v7  ;;  %673 = vmatpush3.bf16.msra.mxu1 %v692_v7  ;;  %p770_p2 = scmp.ne.s32.totalorder %s474_s13, %s769_s14  ;;  %p775_p4 = scmp.lt.s32.totalorder %s769_s14, %s769_s14 }
  0x36   :  { %606 = vmatprep.subr.bf16.mxu0 %v693_v8  ;;  %666 = vmatprep.subr.bf16.mxu1 %v693_v8 }
  0x37   :  { %p776_p5 = por %p775_p4, %p774_p3 }
  0x39   :  { %607 = vmatpush3.bf16.msra.mxu0 %v694_v9  ;;  %674 = vmatpush3.bf16.msra.mxu1 %v694_v9  ;;  %p777_p6 = pnand %p776_p5, %p770_p2 }
  0x3a   :  { %608 = vmatprep.subr.bf16.mxu0 %v695_v10  ;;  %667 = vmatprep.subr.bf16.mxu1 %v695_v10 }
  0x3d   :  { %609 = vmatpush3.bf16.msra.mxu0 %v696_v13  ;;  %675 = vmatpush3.bf16.msra.mxu1 %v696_v13 }
  0x3e   :  { %610 = vmatprep.subr.bf16.mxu0 %v697_v14  ;;  %668 = vmatprep.subr.bf16.mxu1 %v697_v14 }
  0x41   :  { %611 = vmatpush3.bf16.msra.mxu0 %v698_v15  ;;  %676 = vmatpush3.bf16.msra.mxu1 %v698_v15 }
  0x42   :  { %612 = vmatprep.subr.bf16.mxu0 %v699_v16  ;;  %669 = vmatprep.subr.bf16.mxu1 %v699_v16 }
  0x45   :  { %613 = vmatpush3.bf16.msra.mxu0 %v700_v17  ;;  %677 = vmatpush3.bf16.msra.mxu1 %v700_v17 }
  0x48   :  { %308 = vmatmul.mubr.bf16.vlgmr.msra.gmra.mrb[0].mxu0 %v701_v18  ;;  %340 = vmatmul.mubr.bf16.vlgmr.msra.gmra.mrb[0].mxu1 %v704_v19 }
  0x49   :  { %315 = vmatprep.mubr.bf16.mxu0 %v707_v20  ;;  %347 = vmatprep.mubr.bf16.mxu1 %v709_v21 }
  0x50   :  { %316 = vmatmul.mubr.bf16.gmra.mrb[4].mxu0 %v711_v22  ;;  %348 = vmatmul.mubr.bf16.gmra.mrb[4].mxu1 %v712_v23 }
  0x51   :  { %323 = vmatprep.mubr.bf16.mxu0 %v713_v24  ;;  %355 = vmatprep.mubr.bf16.mxu1 %v715_v25 }
  0x58   :  { %324 = vmatmul.mubr.bf16.gmra.mrb[8].mxu0 %v717_v26  ;;  %356 = vmatmul.mubr.bf16.gmra.mrb[8].mxu1 %v718_v27 }
  0x59   :  { %331 = vmatprep.mubr.bf16.mxu0 %v719_v28  ;;  %363 = vmatprep.mubr.bf16.mxu1 %v721_v29 }
  0x60   :  { %332 = vmatmul.mubr.bf16.gmra.mrb[12].mxu0 %v723_v30  ;;  %364 = vmatmul.mubr.bf16.gmra.mrb[12].mxu1 %v724_v31 }
 0x11b   :  { %v614_v32 = vpop.f32.mrb[0].mxu0  ;;  %v638_v33 = vpop.f32.mrb[0].mxu1 }
 0x11c   :  { %v615_v35 = vpop.f32.mrb[1].mxu0  ;;  %v639_v36 = vpop.f32.mrb[1].mxu1 }
 0x11d   :  { %v616_v37 = vadd.f32 %v615_v35, %v614_v32  ;;  %v640_v38 = vadd.f32 %v639_v36, %v638_v33  ;;  %v617_v39 = vpop.f32.mrb[2].mxu0  ;;  %v641_v40 = vpop.f32.mrb[2].mxu1 }
 0x11e   :  { %v618_v41 = vpop.f32.mrb[3].mxu0  ;;  %v642_v42 = vpop.f32.mrb[3].mxu1 }
 0x11f   :  { %v310_v43 = vadd.f32 %v616_v37, %v854_v34  ;;  %v342_v44 = vadd.f32 %v640_v38, %v854_v34  ;;  %v619_v45 = vadd.f32 %v618_v41, %v617_v39  ;;  %v643_v46 = vadd.f32 %v642_v42, %v641_v40 }
 0x121   :  { %v313_v47 = vadd.f32 %v619_v45, %v854_v34  ;;  %v345_v48 = vadd.f32 %v643_v46, %v854_v34  ;;  %v372_v49 = vmax.f32 %v310_v43, 0.0  ;;  %v380_v50 = vmax.f32 %v342_v44, 0.0 }
 0x123   :  { %v373_v51 = vmax.f32 %v313_v47, 0.0  ;;  %v381_v52 = vmax.f32 %v345_v48, 0.0  ;;  %v620_v53 = vpop.f32.mrb[4].mxu0  ;;  %v644_v54 = vpop.f32.mrb[4].mxu1 }
 0x124   :  { %v621_v55 = vpop.f32.mrb[5].mxu0  ;;  %v645_v56 = vpop.f32.mrb[5].mxu1 }
 0x125   :  { %v554_v57 = vpack.c.bf16 %v373_v51, %v372_v49  ;;  %v574_v58 = vpack.c.bf16 %v381_v52, %v380_v50  ;;  %v622_v59 = vadd.f32 %v621_v55, %v620_v53  ;;  %v646_v60 = vadd.f32 %v645_v56, %v644_v54  ;;  %v623_v61 = vpop.f32.mrb[6].mxu0  ;;  %v647_v62 = vpop.f32.mrb[6].mxu1 }
 0x126   :  { %v624_v63 = vpop.f32.mrb[7].mxu0  ;;  %v648_v0 = vpop.f32.mrb[7].mxu1 }
 0x127   :  { %555 = vst [vmem:[#allocation7] sm:$0xff] %v554_v57   ;;  %594 = vst [vmem:[#allocation7 + $0x20] sm:$0xff] %v574_v58   ;;  %v318_v1 = vadd.f32 %v622_v59, %v854_v34  ;;  %v350_v2 = vadd.f32 %v646_v60, %v854_v34  ;;  %v625_v3 = vadd.f32 %v624_v63, %v623_v61 }
 0x128   :  { %v649_v4 = vadd.f32 %v648_v0, %v647_v62 }
 0x129   :  { %v321_v5 = vadd.f32 %v625_v3, %v854_v34  ;;  %v374_v7 = vmax.f32 %v318_v1, 0.0  ;;  %v382_v8 = vmax.f32 %v350_v2, 0.0 }
 0x12a   :  { %v353_v6 = vadd.f32 %v649_v4, %v854_v34 }
 0x12b   :  { %v375_v9 = vmax.f32 %v321_v5, 0.0  ;;  %v626_v11 = vpop.f32.mrb[8].mxu0  ;;  %v650_v12 = vpop.f32.mrb[8].mxu1 }
 0x12c   :  { %v383_v10 = vmax.f32 %v353_v6, 0.0  ;;  %v627_v13 = vpop.f32.mrb[9].mxu0  ;;  %v651_v14 = vpop.f32.mrb[9].mxu1 }
 0x12d   :  { %v559_v15 = vpack.c.bf16 %v375_v9, %v374_v7  ;;  %v628_v17 = vadd.f32 %v627_v13, %v626_v11  ;;  %v652_v18 = vadd.f32 %v651_v14, %v650_v12  ;;  %v629_v19 = vpop.f32.mrb[10].mxu0  ;;  %v653_v20 = vpop.f32.mrb[10].mxu1 }
 0x12e   :  { %v579_v16 = vpack.c.bf16 %v383_v10, %v382_v8  ;;  %v630_v21 = vpop.f32.mrb[11].mxu0  ;;  %v654_v22 = vpop.f32.mrb[11].mxu1 }
 0x12f   :  { %591 = vst [vmem:[#allocation7 + $0x8] sm:$0xff] %v559_v15   ;;  %v326_v23 = vadd.f32 %v628_v17, %v854_v34  ;;  %v358_v24 = vadd.f32 %v652_v18, %v854_v34  ;;  %v631_v25 = vadd.f32 %v630_v21, %v629_v19  ;;  %v655_v26 = vadd.f32 %v654_v22, %v653_v20 }
 0x130   :  { %595 = vst [vmem:[#allocation7 + $0x28] sm:$0xff] %v579_v16  }
 0x131   :  { %v329_v27 = vadd.f32 %v631_v25, %v854_v34  ;;  %v361_v28 = vadd.f32 %v655_v26, %v854_v34  ;;  %v376_v29 = vmax.f32 %v326_v23, 0.0  ;;  %v384_v30 = vmax.f32 %v358_v24, 0.0 }
 0x133   :  { %v377_v31 = vmax.f32 %v329_v27, 0.0  ;;  %v385_v32 = vmax.f32 %v361_v28, 0.0  ;;  %v632_v33 = vpop.f32.mrb[12].mxu0  ;;  %v656_v35 = vpop.f32.mrb[12].mxu1 }
 0x134   :  { %v633_v36 = vpop.f32.mrb[13].mxu0  ;;  %v657_v37 = vpop.f32.mrb[13].mxu1 }
 0x135   :  { %v564_v38 = vpack.c.bf16 %v377_v31, %v376_v29  ;;  %v584_v39 = vpack.c.bf16 %v385_v32, %v384_v30  ;;  %v634_v40 = vadd.f32 %v633_v36, %v632_v33  ;;  %v658_v41 = vadd.f32 %v657_v37, %v656_v35  ;;  %v635_v42 = vpop.f32.mrb[14].mxu0  ;;  %v659_v43 = vpop.f32.mrb[14].mxu1 }
 0x136   :  { %v636_v44 = vpop.f32.mrb[15].mxu0  ;;  %v660_v45 = vpop.f32.mrb[15].mxu1 }
 0x137   :  { %592 = vst [vmem:[#allocation7 + $0x10] sm:$0xff] %v564_v38   ;;  %596 = vst [vmem:[#allocation7 + $0x30] sm:$0xff] %v584_v39   ;;  %v334_v46 = vadd.f32 %v634_v40, %v854_v34  ;;  %v366_v47 = vadd.f32 %v658_v41, %v854_v34  ;;  %v637_v48 = vadd.f32 %v636_v44, %v635_v42 }
 0x138   :  { %v661_v49 = vadd.f32 %v660_v45, %v659_v43 }
 0x139   :  { %v337_v50 = vadd.f32 %v637_v48, %v854_v34  ;;  %v378_v52 = vmax.f32 %v334_v46, 0.0  ;;  %v386_v53 = vmax.f32 %v366_v47, 0.0 }
 0x13a   :  { %v369_v51 = vadd.f32 %v661_v49, %v854_v34 }
 0x13b   :  { %v379_v54 = vmax.f32 %v337_v50, 0.0 }
 0x13c   :  { %v387_v55 = vmax.f32 %v369_v51, 0.0 }
 0x13d   :  { %v569_v56 = vpack.c.bf16 %v379_v54, %v378_v52 }
 0x13e   :  { %v589_v57 = vpack.c.bf16 %v387_v55, %v386_v53 }
 0x13f   :  { %593 = vst [vmem:[#allocation7 + $0x18] sm:$0xff] %v569_v56  }
 0x140   :  { %597 = vst [vmem:[#allocation7 + $0x38] sm:$0xff] %v589_v57  }
 0x141   :  { %780 = shalt.err (!%p777_p6)
}
 0x142   :  { %s781_s17 = scalar_lea.hbm %s890_s3, 1024 }
 0x143   :  { %p782_p7 = scmp.ne.s32.totalorder %s890_s3, %s781_s17  ;;  %p785_p8 = scmp.lt.u32.totalorder %s781_s17, %s890_s3 }
 0x145   :  { %p787_p9 = pnand %p785_p8, %p782_p7 }
 0x147   :  { %790 = shalt.err (!%p787_p9)
}
 0x148   :  { %479 = dma.vmem_to_hbm [thread:$0]  %s474_s13, 1024, %s890_s3, [#allocation4], %s801_s0, %s801_s0, %s802_s9  }
 0x149   :  { %795 = dma.done.wait [#allocation4], 1024  }
 0x14a   :  { %796 = vsyncadd [#allocation4], 4294966272 }
 0x14b   :  { %483 = vsyncpa [#allocation3], 1 }
 0x14c   :  { %484 = vsyncpa [#allocation6], 1 }
 0x14d   :  { %485 = vsyncpa [#allocation4], 1 }

</bundles_post_ra>
